<compile_context>
chip_gen: v6e
topology: v6e:2x2x1
jax: 0.10.0
libtpu: 0.0.40
codegen_flags: <defaults>
</compile_context>

<pallas_src>
import functools

import jax
import jax.numpy as jnp
import numpy as np
from jax import lax
from jax.experimental import pallas as pl
from jax.experimental.pallas import tpu as pltpu

LN_EPS = 1e-5  # F.layer_norm default


# ---------------------------------------------------------------------------
# Pass 1: per-B-tile partial reductions (the heavy kernel, "parallel" grid).
# ---------------------------------------------------------------------------
def _partials_kernel(x_ref, w1t_ref, red_ref, colsum_ref, sscol_ref, hw_ref):
    # x_ref   : (in_dim+1, TB)  x^T with ones bias row, zero-padded batch columns (lane = batch)
    # w1t_ref : (H_PAD, in_dim+1)  [W1^T | b1], zero-padded hidden rows
    # red_ref : (8, H_PAD)  row0 = ones (column sums), row1 = w2 (head), rows 2..7 = 0
    # outputs : (1, TB) each  — per-column sum(ht), sum(ht^2), w2·ht
    ht = lax.dot_general(
        w1t_ref[...], x_ref[...],
        dimension_numbers=(((1,), (0,)), ((), ())),
        preferred_element_type=jnp.float32)          # (H_PAD, TB), bias already folded in
    ht = jnp.maximum(ht, 0.0)                        # padded rows / padded columns stay exactly 0

    # Per-column sum and w2-weighted head in ONE extra MXU dot (MXU is nearly idle at K≈33).
    red = lax.dot_general(
        red_ref[...], ht,
        dimension_numbers=(((1,), (0,)), ((), ())),
        preferred_element_type=jnp.float32)          # (8, TB)

    colsum_ref[...] = red[0:1, :]
    hw_ref[...] = red[1:2, :]
    sscol_ref[...] = jnp.sum(ht * ht, axis=0, keepdims=True)   # only this reduce stays on VPU/XLU


# ---------------------------------------------------------------------------
# Pass 2: tiny finalize — global LN stats + affine head, lane-dense output.
# ---------------------------------------------------------------------------
def _finalize_kernel(colsum_ref, sscol_ref, hw_ref, scal_ref, out_ref, *, n_elems):
    s = jnp.sum(colsum_ref[...])                     # padded columns contribute 0
    ss = jnp.sum(sscol_ref[...])
    mean = s / n_elems                               # divisor = B * real_hidden
    var = ss / n_elems - mean * mean                 # biased variance, like PyTorch LN
    inv_std = lax.rsqrt(var + LN_EPS)
    w2_sum = scal_ref[0, 0]
    b2 = scal_ref[0, 1]
    # out[b] = (1+inv_std) * (w2·ht[:,b]) - mean*inv_std*sum(w2) + b2
    out_ref[...] = (1.0 + inv_std) * hw_ref[...] - (mean * inv_std) * w2_sum + b2


# ---------------------------------------------------------------------------
# One-time weight prep (hoisted out of the per-call path).
# ---------------------------------------------------------------------------
def prepare_fitness_params(w1, b1, w2, b2, mxu_dtype=jnp.float32):
    """w1: (in_dim, H); b1: (1, H) or (H,); w2: (H, 1); b2: (1, 1) or scalar.
    mxu_dtype=jnp.bfloat16 halves x/w1 HBM traffic on v5e/v6e (stats stay f32)."""
    in_dim, hidden = w1.shape
    h_pad = 128 * pl.cdiv(hidden, 128)

    w1_f = jnp.asarray(w1, jnp.float32)
    b1_f = jnp.asarray(b1, jnp.float32).reshape(hidden)
    w2_f = jnp.asarray(w2, jnp.float32).reshape(hidden)
    b2_f = jnp.asarray(b2, jnp.float32).reshape(())

    # [W1^T | b1] with zero-padded hidden rows -> (H_PAD, in_dim+1)
    w1t_aug = jnp.concatenate([w1_f.T, b1_f[:, None]], axis=1)
    w1t_aug = jnp.pad(w1t_aug, ((0, h_pad - hidden), (0, 0))).astype(mxu_dtype)

    # MXU reduction LHS: row0 = ones (per-column sums), row1 = w2 (head). Padded lanes are 0.
    red_lhs = jnp.zeros((8, h_pad), jnp.float32)
    red_lhs = red_lhs.at[0, :].set(1.0)
    red_lhs = red_lhs.at[1, :hidden].set(w2_f)

    scal = jnp.stack([jnp.sum(w2_f), b2_f]).reshape(1, 2)   # [sum(w2), b2] in SMEM

    return {"w1t": w1t_aug, "red_lhs": red_lhs, "scal": scal, "hidden": hidden}


# ---------------------------------------------------------------------------
# Forward with prepared params (per-call path).
# ---------------------------------------------------------------------------
@functools.partial(jax.jit, static_argnames=("hidden",))
def fitness_net_forward_prepared(x, w1t, red_lhs, scal, *, hidden):
    B, in_dim = x.shape
    h_pad, k_aug = w1t.shape
    assert k_aug == in_dim + 1, "prepared weights do not match x's feature dim"

    mxu_dtype = w1t.dtype
    itemsize = w1t.dtype.itemsize

    # Batch tiling: lane-dense tiles (multiple of 128), capped so VMEM stays bounded.
    tb = min(512, 128 * pl.cdiv(B, 128))
    n_tiles = pl.cdiv(B, tb)
    b_pad = tb * n_tiles

    # x^T with ones bias row; zero-pad batch columns -> padded columns give ht = relu(0) = 0,
    # so the whole-tensor LN sums are unaffected (no mask / correction needed).
    xt = jnp.concatenate([x.astype(jnp.float32).T, jnp.ones((1, B), jnp.float32)], axis=0)
    xt = jnp.pad(xt, ((0, 0), (0, b_pad - B))).astype(mxu_dtype)

    # Advisory cost + VMEM sizing (per-tile working set; independent of B).
    flops = (2 * h_pad * k_aug + 2 * 8 * h_pad + 3 * h_pad) * b_pad
    bytes_accessed = ((k_aug * b_pad + h_pad * k_aug) * itemsize
                      + 8 * h_pad * 4 + 3 * b_pad * 4)
    vmem_needed = (2 * k_aug * tb * itemsize          # double-buffered x tile
                   + h_pad * k_aug * itemsize         # resident w1t
                   + 8 * h_pad * 4                    # resident reduction LHS
                   + 2 * 3 * tb * 4                   # double-buffered outputs
                   + 4 * h_pad * tb * 4               # ht / ht^2 / red temporaries
                   + (2 << 20))
    vmem_limit = int(min(max(vmem_needed, 8 << 20), 48 << 20))

    colsum, sscol, hw = pl.pallas_call(
        _partials_kernel,
        out_shape=(jax.ShapeDtypeStruct((1, b_pad), jnp.float32),) * 3,
        grid_spec=pltpu.PrefetchScalarGridSpec(
            num_scalar_prefetch=0,
            grid=(n_tiles,),
            in_specs=[
                pl.BlockSpec((k_aug, tb), lambda j: (0, j)),     # x^T tile (lane = batch)
                pl.BlockSpec((h_pad, k_aug), lambda j: (0, 0)),  # [W1^T | b1], resident
                pl.BlockSpec((8, h_pad), lambda j: (0, 0)),      # reduction LHS, resident
            ],
            out_specs=[pl.BlockSpec((1, tb), lambda j: (0, j)) for _ in range(3)],
        ),
        compiler_params=pltpu.CompilerParams(
            dimension_semantics=("parallel",),       # B tiles are independent -> megacore split
            vmem_limit_bytes=vmem_limit),
        cost_estimate=pl.CostEstimate(flops=int(flops), transcendentals=0,
                                      bytes_accessed=int(bytes_accessed)),
    )(xt, w1t, red_lhs)

    out = pl.pallas_call(
        functools.partial(_finalize_kernel, n_elems=float(B * hidden)),
        out_shape=jax.ShapeDtypeStruct((1, b_pad), jnp.float32),
        in_specs=[
            pl.BlockSpec(memory_space=pltpu.MemorySpace.VMEM),
            pl.BlockSpec(memory_space=pltpu.MemorySpace.VMEM),
            pl.BlockSpec(memory_space=pltpu.MemorySpace.VMEM),
            pl.BlockSpec(memory_space=pltpu.MemorySpace.SMEM),   # [sum(w2), b2] scalars
        ],
        out_specs=pl.BlockSpec(memory_space=pltpu.MemorySpace.VMEM),
        compiler_params=pltpu.CompilerParams(vmem_limit_bytes=vmem_limit),
    )(colsum, sscol, hw, scal)

    return out[:, :B].reshape(B, 1)


def fitness_net_forward(x, w1, b1, w2, b2, mxu_dtype=jnp.float32):
    """Convenience one-shot API (prep + forward). Prefer prepare_* + *_prepared when the
    weights are reused across calls."""
    prep = prepare_fitness_params(w1, b1, w2, b2, mxu_dtype=mxu_dtype)
    return fitness_net_forward_prepared(x, prep["w1t"], prep["red_lhs"], prep["scal"],
                                        hidden=prep["hidden"])


# ---------------------------------------------------------------------------
# Reference + demo
# ---------------------------------------------------------------------------
def _reference_forward(x, w1, b1, w2, b2):
    h = jnp.maximum(x @ w1 + b1, 0.0)
    mean = jnp.mean(h)
    var = jnp.mean((h - mean) ** 2)
    ln = (h - mean) / jnp.sqrt(var + LN_EPS)
    h = h + ln
    return h @ w2 + b2


def _init_linear(key, fan_in, fan_out):
    # PyTorch nn.Linear default: U(-1/sqrt(fan_in), 1/sqrt(fan_in)) for W and b.
    kw, kb = jax.random.split(key)
    bound = 1.0 / np.sqrt(fan_in)
    w = jax.random.uniform(kw, (fan_in, fan_out), jnp.float32, -bound, bound)
    b = jax.random.uniform(kb, (1, fan_out), jnp.float32, -bound, bound)
    return w, b


if __name__ == "__main__":
    key = jax.random.PRNGKey(0)
    k_x, k_l1, k_l2 = jax.random.split(key, 3)

    batch, in_dim = 8, 32
    hidden = in_dim // 2 + 1  # 17

    x = jax.random.normal(k_x, (batch, in_dim), jnp.float32)
    w1, b1 = _init_linear(k_l1, in_dim, hidden)
    w2, b2 = _init_linear(k_l2, hidden, 1)

    # One-time weight prep (hoisted out of the per-call jit path), then the kernel call.
    prep = prepare_fitness_params(w1, b1, w2, b2)
    out = fitness_net_forward_prepared(x, prep["w1t"], prep["red_lhs"], prep["scal"],
                                       hidden=prep["hidden"])
    out = jax.block_until_ready(out)

    ref = _reference_forward(x, w1, b1, w2, b2)
    np.testing.assert_allclose(np.asarray(out), np.asarray(ref), rtol=2e-5, atol=2e-5)

    print("KERNEL_OK")
</pallas_src>

<mosaic_0001>
module attributes {stable_mosaic.version = 11 : i64} {
  func.func @_partials_kernel(%arg0: i32, %arg1: memref<33x128xf32, #tpu.memory_space<vmem>>, %arg2: memref<128x33xf32, #tpu.memory_space<vmem>>, %arg3: memref<8x128xf32, #tpu.memory_space<vmem>>, %arg4: memref<1x128xf32, #tpu.memory_space<vmem>>, %arg5: memref<1x128xf32, #tpu.memory_space<vmem>>, %arg6: memref<1x128xf32, #tpu.memory_space<vmem>>) attributes {dimension_semantics = [#tpu.dimension_semantics<parallel>], iteration_bounds = array<i64: 1>, scalar_prefetch = 0 : i64, scratch_operands = 0 : i64, tpu.core_type = #tpu.core_type<tc>, window_params = [{transform_indices = @transform_0, window_bounds = array<i64: 33, 128>}, {pipeline_mode = #tpu.pipeline_mode<synchronous>, transform_indices = @transform_1, window_bounds = array<i64: 128, 33>}, {pipeline_mode = #tpu.pipeline_mode<synchronous>, transform_indices = @transform_2, window_bounds = array<i64: 8, 128>}, {transform_indices = @transform_3, window_bounds = array<i64: 1, 128>}, {transform_indices = @transform_4, window_bounds = array<i64: 1, 128>}, {transform_indices = @transform_5, window_bounds = array<i64: 1, 128>}]} {
    %c0 = arith.constant 0 : index
    %c0_0 = arith.constant 0 : index
    %0 = vector.load %arg2[%c0, %c0_0] : memref<128x33xf32, #tpu.memory_space<vmem>>, vector<128x33xf32>
    %c0_1 = arith.constant 0 : index
    %c0_2 = arith.constant 0 : index
    %1 = vector.load %arg1[%c0_1, %c0_2] : memref<33x128xf32, #tpu.memory_space<vmem>>, vector<33x128xf32>
    %cst = arith.constant dense<0.000000e+00> : vector<128x128xf32>
    %2 = tpu.matmul %0, %1, %cst {dimension_numbers = #tpu.dot_dimension_numbers<[1], [0], [0], [1], [0, 0, 1, 1], [], []>} : vector<128x33xf32>, vector<33x128xf32>, vector<128x128xf32> -> vector<128x128xf32>
    %cst_3 = arith.constant 0.000000e+00 : f32
    %3 = vector.broadcast %cst_3 : f32 to vector<128x128xf32>
    %4 = arith.maximumf %2, %3 : vector<128x128xf32>
    %c0_4 = arith.constant 0 : index
    %c0_5 = arith.constant 0 : index
    %5 = vector.load %arg3[%c0_4, %c0_5] : memref<8x128xf32, #tpu.memory_space<vmem>>, vector<8x128xf32>
    %cst_6 = arith.constant dense<0.000000e+00> : vector<8x128xf32>
    %6 = tpu.matmul %5, %4, %cst_6 {dimension_numbers = #tpu.dot_dimension_numbers<[1], [0], [0], [1], [0, 0, 1, 1], [], []>} : vector<8x128xf32>, vector<128x128xf32>, vector<8x128xf32> -> vector<8x128xf32>
    %7 = vector.extract_strided_slice %6 {offsets = [0, 0], sizes = [1, 128], strides = [1, 1]} : vector<8x128xf32> to vector<1x128xf32>
    %c0_7 = arith.constant 0 : index
    %c0_8 = arith.constant 0 : index
    %8 = vector.load %arg4[%c0_7, %c0_8] : memref<1x128xf32, #tpu.memory_space<vmem>>, vector<1x128xf32>
    tpu.vector_store %arg4[%c0_7, %c0_8], %7 {strides = array<i32>} : memref<1x128xf32, #tpu.memory_space<vmem>>, vector<1x128xf32>,
    %9 = vector.extract_strided_slice %6 {offsets = [1, 0], sizes = [1, 128], strides = [1, 1]} : vector<8x128xf32> to vector<1x128xf32>
    %c0_9 = arith.constant 0 : index
    %c0_10 = arith.constant 0 : index
    %10 = vector.load %arg6[%c0_9, %c0_10] : memref<1x128xf32, #tpu.memory_space<vmem>>, vector<1x128xf32>
    tpu.vector_store %arg6[%c0_9, %c0_10], %9 {strides = array<i32>} : memref<1x128xf32, #tpu.memory_space<vmem>>, vector<1x128xf32>,
    %11 = arith.mulf %4, %4 : vector<128x128xf32>
    %cst_11 = arith.constant dense<0.000000e+00> : vector<128xf32>
    %12 = vector.multi_reduction <add>, %11, %cst_11 [0] : vector<128x128xf32> to vector<128xf32>
    %13 = vector.shape_cast %12 : vector<128xf32> to vector<1x128xf32>
    %c0_12 = arith.constant 0 : index
    %c0_13 = arith.constant 0 : index
    %14 = vector.load %arg5[%c0_12, %c0_13] : memref<1x128xf32, #tpu.memory_space<vmem>>, vector<1x128xf32>
    tpu.vector_store %arg5[%c0_12, %c0_13], %13 {strides = array<i32>} : memref<1x128xf32, #tpu.memory_space<vmem>>, vector<1x128xf32>,
    return
  }
  func.func @transform_0(%arg0: i32) -> (i32, i32) {
    %c0_i32 = arith.constant 0 : i32
    %c0_i32_0 = arith.constant 0 : i32
    return %c0_i32, %arg0 : i32, i32
  }
  func.func @transform_1(%arg0: i32) -> (i32, i32) {
    %c0_i32 = arith.constant 0 : i32
    %c0_i32_0 = arith.constant 0 : i32
    %c0_i32_1 = arith.constant 0 : i32
    return %c0_i32, %c0_i32_0 : i32, i32
  }
  func.func @transform_2(%arg0: i32) -> (i32, i32) {
    %c0_i32 = arith.constant 0 : i32
    %c0_i32_0 = arith.constant 0 : i32
    %c0_i32_1 = arith.constant 0 : i32
    return %c0_i32, %c0_i32_0 : i32, i32
  }
  func.func @transform_3(%arg0: i32) -> (i32, i32) {
    %c0_i32 = arith.constant 0 : i32
    %c0_i32_0 = arith.constant 0 : i32
    return %c0_i32, %arg0 : i32, i32
  }
  func.func @transform_4(%arg0: i32) -> (i32, i32) {
    %c0_i32 = arith.constant 0 : i32
    %c0_i32_0 = arith.constant 0 : i32
    return %c0_i32, %arg0 : i32, i32
  }
  func.func @transform_5(%arg0: i32) -> (i32, i32) {
    %c0_i32 = arith.constant 0 : i32
    %c0_i32_0 = arith.constant 0 : i32
    return %c0_i32, %arg0 : i32, i32
  }
}

module attributes {stable_mosaic.version = 11 : i64} {
  func.func @_finalize_kernel(%arg0: memref<1x128xf32, #tpu.memory_space<vmem>>, %arg1: memref<1x128xf32, #tpu.memory_space<vmem>>, %arg2: memref<1x128xf32, #tpu.memory_space<vmem>>, %arg3: memref<1x2xf32, #tpu.memory_space<smem>>, %arg4: memref<1x128xf32, #tpu.memory_space<vmem>>) attributes {dimension_semantics = [], scalar_prefetch = 0 : i64, scratch_operands = 0 : i64, tpu.core_type = #tpu.core_type<tc>} {
    %c0 = arith.constant 0 : index
    %c0_0 = arith.constant 0 : index
    %0 = vector.load %arg0[%c0, %c0_0] : memref<1x128xf32, #tpu.memory_space<vmem>>, vector<1x128xf32>
    %1 = vector.shape_cast %0 : vector<1x128xf32> to vector<1x1x128xf32>
    %cst = arith.constant dense<0.000000e+00> : vector<1xf32>
    %2 = vector.multi_reduction <add>, %1, %cst [1, 2] : vector<1x1x128xf32> to vector<1xf32>
    %3 = vector.shape_cast %2 : vector<1xf32> to vector<1x1x1xf32>
    %4 = vector.extract %3[0, 0, 0] : f32 from vector<1x1x1xf32>
    %c0_1 = arith.constant 0 : index
    %c0_2 = arith.constant 0 : index
    %5 = vector.load %arg1[%c0_1, %c0_2] : memref<1x128xf32, #tpu.memory_space<vmem>>, vector<1x128xf32>
    %6 = vector.shape_cast %5 : vector<1x128xf32> to vector<1x1x128xf32>
    %cst_3 = arith.constant dense<0.000000e+00> : vector<1xf32>
    %7 = vector.multi_reduction <add>, %6, %cst_3 [1, 2] : vector<1x1x128xf32> to vector<1xf32>
    %8 = vector.shape_cast %7 : vector<1xf32> to vector<1x1x1xf32>
    %9 = vector.extract %8[0, 0, 0] : f32 from vector<1x1x1xf32>
    %cst_4 = arith.constant 1.360000e+02 : f32
    %10 = arith.divf %4, %cst_4 : f32
    %cst_5 = arith.constant 1.360000e+02 : f32
    %11 = arith.divf %9, %cst_5 : f32
    %12 = arith.mulf %10, %10 : f32
    %13 = arith.subf %11, %12 : f32
    %cst_6 = arith.constant 9.99999974E-6 : f32
    %14 = arith.addf %13, %cst_6 : f32
    %15 = math.rsqrt %14 : f32
    %c0_7 = arith.constant 0 : index
    %c0_8 = arith.constant 0 : index
    %16 = memref.load %arg3[%c0_7, %c0_8] : memref<1x2xf32, #tpu.memory_space<smem>>
    %c0_9 = arith.constant 0 : index
    %c1 = arith.constant 1 : index
    %17 = memref.load %arg3[%c0_9, %c1] : memref<1x2xf32, #tpu.memory_space<smem>>
    %cst_10 = arith.constant 1.000000e+00 : f32
    %18 = arith.addf %cst_10, %15 : f32
    %c0_11 = arith.constant 0 : index
    %c0_12 = arith.constant 0 : index
    %19 = vector.load %arg2[%c0_11, %c0_12] : memref<1x128xf32, #tpu.memory_space<vmem>>, vector<1x128xf32>
    %20 = vector.broadcast %18 : f32 to vector<1x128xf32>
    %21 = arith.mulf %20, %19 : vector<1x128xf32>
    %22 = arith.mulf %10, %15 : f32
    %23 = arith.mulf %22, %16 : f32
    %24 = vector.broadcast %23 : f32 to vector<1x128xf32>
    %25 = arith.subf %21, %24 : vector<1x128xf32>
    %26 = vector.broadcast %17 : f32 to vector<1x128xf32>
    %27 = arith.addf %25, %26 : vector<1x128xf32>
    %c0_13 = arith.constant 0 : index
    %c0_14 = arith.constant 0 : index
    %28 = vector.load %arg4[%c0_13, %c0_14] : memref<1x128xf32, #tpu.memory_space<vmem>>, vector<1x128xf32>
    tpu.vector_store %arg4[%c0_13, %c0_14], %27 {strides = array<i32>} : memref<1x128xf32, #tpu.memory_space<vmem>>, vector<1x128xf32>,
    return
  }
}

</mosaic_0001>

<bundles_post_ra>
// kernel: fitness_net_forward_prepared.3
= control target key start
LH: loop header
LB: loop body
LE: loop exit
PB: predicated region body
PF: predicated region fallthrough
CT: control target
= control target key end

     0   :  { %9 = vsyncpa [#allocation3], 0  ;;  %s148_s0 = inlined_call_operand.vmem [shape: f32[1,128], index: 0, kind: input, shape index: {}]   ;;  %s149_s1 = inlined_call_operand.vmem [shape: f32[1,128], index: 1, kind: input, shape index: {}]   ;;  %s150_s2 = inlined_call_operand.vmem [shape: f32[1,128], index: 2, kind: input, shape index: {}]   ;;  %s151_s3 = inlined_call_operand.vmem [shape: f32[1,2], index: 3, kind: input, shape index: {}]   ;;  %s152_s4 = inlined_call_operand.vmem [shape: f32[1,128], index: 4, kind: output, shape index: {}]  }
   0x1   :  { %s22_s17 = sshll.u32 %s151_s3, 4  ;;  %s23_s17 = int_to_ptr.vmem [resolvable:$true] %s22_s17 }
   0x2   :  { %s93_s18 = scalar_lea.vmem %s23_s17, 16  ;;  %p98_p1 = scmp.lt.s32.totalorder %s23_s17, %s23_s17 }
   0x3   :  { %p94_p0 = scmp.ne.s32.totalorder %s23_s17, %s93_s18  ;;  %p99_p2 = scmp.lt.s32.totalorder %s93_s18, %s93_s18 }
   0x5   :  { %p100_p3 = por %p99_p2, %p98_p1 }
   0x7   :  { %p101_p4 = pnand %p100_p3, %p94_p0 }
   0x9   :  { %104 = shalt.err (!%p101_p4)
}
   0xa   :  { %s107_s19 = smov [#allocation2]  }
   0xb   :  { %25 = dma.vmem_to_smem %s23_s17, 16, %s107_s19, [#allocation3]  }
   0xc   :  { %105 = dma.done.wait [#allocation3], 16  }
   0xd   :  { %106 = vsyncadd [#allocation3], 4294967280 }
   0xe   :  { %29 = sfence }
   0xf   :  { %v30_v0 = vld [vmem:[%s148_s0] sm:$0x1]  ;;  %vm31_vm0 = vcmask 1040384   ;;  %s65_s28 = sld [smem:[#allocation2]] }
  0x10   :  { %v42_v1 = vld [vmem:[%s149_s1] sm:$0x1]  ;;  %v32_v2 = vsel %vm31_vm0, %v30_v0, 0.0  ;;  %s83_s29 = sld [smem:[#allocation2 + $0x1]] }
  0x11   :  { %33 = vadd.xlane.f32.xlu0 %v32_v2  ;;  %v43_v3 = vsel %vm31_vm0, %v42_v1, 0.0  ;;  %v68_v20 = vld [vmem:[%s150_s2] sm:$0x1] }
  0x15   :  { %44 = vadd.xlane.f32.xlu0 %v43_v3 }
  0x16   :  { %v75_v24 = vstv %s83_s29 }
  0x9a   :  { %v34_v4 = vpop.xlane.xlu0 %33 }
  0x9b   :  { %v35_v5 = vrot.slane %v34_v4, 4 }
  0x9d   :  { %v36_v6 = vadd.f32 %v35_v5, %v34_v4 }
  0x9e   :  { %v45_v7 = vpop.xlane.xlu0 %44 }
  0x9f   :  { %v37_v8 = vrot.slane %v36_v6, 2  ;;  %v46_v9 = vrot.slane %v45_v7, 4 }
  0xa1   :  { %v47_v10 = vadd.f32 %v46_v9, %v45_v7  ;;  %v38_v11 = vadd.f32 %v37_v8, %v36_v6 }
  0xa3   :  { %v48_v12 = vrot.slane %v47_v10, 2  ;;  %v39_v13 = vrot.slane %v38_v11, 1 }
  0xa5   :  { %v49_v14 = vadd.f32 %v48_v12, %v47_v10  ;;  %v40_v15 = vadd.f32 %v39_v13, %v38_v11 }
  0xa7   :  { %84 = vpush %v40_v15  ;;  %v50_v16 = vrot.slane %v49_v14, 1 }
  0xa9   :  { %v51_v17 = vadd.f32 %v50_v16, %v49_v14 }
  0xab   :  { %86 = vpush %v51_v17 }
  0xd8   :  { %s85_s0 = spop %84 }
  0xd9   :  { %s55_s1 = smul.f32 0.007352941, %s85_s0 }
  0xdb   :  { %s59_s23 = smul.f32 %s55_s1, %s55_s1 }
  0xdc   :  { %s87_s24 = spop %86 }
  0xdd   :  { %s58_s25 = smul.f32 0.007352941, %s87_s24 }
  0xdf   :  { %s60_s26 = ssub.f32 %s58_s25, %s59_s23 }
  0xe1   :  { %s61_s27 = sadd.f32 1e-05, %s60_s26 }
  0xe3   :  { %v62_v18 = vstv %s61_s27 }
  0xe4   :  { %91 = vrsqrt.f32 %v62_v18 }
  0xf1   :  { %v92_v19 = vpop.eup %91 }
  0xf2   :  { %88 = vpush %v92_v19 }
 0x123   :  { %s89_s30 = spop %88 }
 0x124   :  { %s67_s5 = sadd.f32 1.0, %s89_s30  ;;  %s71_s8 = smul.f32 %s89_s30, %s55_s1 }
 0x126   :  { %v69_v21 = vstv %s67_s5  ;;  %s72_s9 = smul.f32 %s71_s8, %s65_s28 }
 0x127   :  { %v70_v22 = vmul.f32 %v69_v21, %v68_v20 }
 0x128   :  { %v73_v23 = vstv %s72_s9 }
 0x129   :  { %v74_v25 = vsub.f32 %v70_v22, %v73_v23 }
 0x12b   :  { %v76_v26 = vadd.f32 %v75_v24, %v74_v25 }
 0x12d   :  { %77 = vst [vmem:[%s152_s4] sm:$0x1] %v76_v26 }
 0x12e   :  { %82 = vsyncpa [#allocation3], 1 }

// kernel: fitness_net_forward_prepared.2
= control target key start
LH: loop header
LB: loop body
LE: loop exit
PB: predicated region body
PF: predicated region fallthrough
CT: control target
= control target key end

     0   :  { %vm87_vm0 = vcmask 1040384   ;;  %vm38_vm1 = vcmask 269312   ;;  %v501_v21 = vmov 0.0   ;;  %vm502_vm2 = vmmov 0   ;;  %s676_s0 = inlined_call_operand.vmem [shape: f32[33,128], index: 0, kind: input, shape index: {}]   ;;  %s677_s1 = inlined_call_operand.vmem [shape: f32[128,33], index: 1, kind: input, shape index: {}]   ;;  %s678_s4 = inlined_call_operand.vmem [shape: f32[1,128], index: 4, kind: output, shape index: {1}]   ;;  %s679_s2 = inlined_call_operand.vmem [shape: f32[8,128], index: 2, kind: input, shape index: {}]   ;;  %s680_s3 = inlined_call_operand.vmem [shape: f32[1,128], index: 3, kind: output, shape index: {0}]   ;;  %s681_s5 = inlined_call_operand.vmem [shape: f32[1,128], index: 5, kind: output, shape index: {2}]  }
   0x1   :  { %v37_v0 = vld [vmem:[%s676_s0 + $0x20] sm:$0x1]  ;;  %v36_v1 = vld [vmem:[%s676_s0 + $0x18] sm:$0xff]  ;;  %v35_v3 = vld [vmem:[%s676_s0 + $0x10] sm:$0xff]  ;;  %464 = vmatprep.subr.mxu1 %v501_v21  ;;  %496 = vmatprep.mubr.msk.f32.mxu1 %vm502_vm2, %v501_v21 }
   0x2   :  { %430 = vmatprep.subr.msk.mxu0 %vm87_vm0, %v37_v0  ;;  %v17_v2 = vld [vmem:[%s677_s1] sm:$0xff]  ;;  %v34_v4 = vld [vmem:[%s676_s0 + $0x8] sm:$0xff]  ;;  %v19_v7 = vld [vmem:[%s677_s1 + $0x10] sm:$0xff] }
   0x3   :  { %431 = vmatpush3.msk.msra.mxu0 %vm87_vm0, %v37_v0  ;;  %440 = vmatprep.mubr.msk.f32.mxu0 %vm38_vm1, %v17_v2  ;;  %v33_v5 = vld [vmem:[%s676_s0] sm:$0xff]  ;;  %v18_v6 = vld [vmem:[%s677_s1 + $0x8] sm:$0xff]  ;;  %v20_v8 = vld [vmem:[%s677_s1 + $0x18] sm:$0xff] }
   0x4   :  { %432 = vmatprep.subr.mxu0 %v36_v1  ;;  %v21_v9 = vld [vmem:[%s677_s1 + $0x20] sm:$0xff]  ;;  %v22_v10 = vld [vmem:[%s677_s1 + $0x28] sm:$0xff]  ;;  %v23_v11 = vld [vmem:[%s677_s1 + $0x30] sm:$0xff] }
   0x5   :  { %433 = vmatpush3.msra.mxu0 %v36_v1  ;;  %v24_v12 = vld [vmem:[%s677_s1 + $0x38] sm:$0xff]  ;;  %v25_v13 = vld [vmem:[%s677_s1 + $0x40] sm:$0xff]  ;;  %v26_v14 = vld [vmem:[%s677_s1 + $0x48] sm:$0xff] }
   0x6   :  { %434 = vmatprep.subr.mxu0 %v35_v3  ;;  %v27_v15 = vld [vmem:[%s677_s1 + $0x50] sm:$0xff]  ;;  %v28_v16 = vld [vmem:[%s677_s1 + $0x58] sm:$0xff]  ;;  %v29_v17 = vld [vmem:[%s677_s1 + $0x60] sm:$0xff] }
   0x7   :  { %435 = vmatpush3.msra.mxu0 %v35_v3  ;;  %v30_v18 = vld [vmem:[%s677_s1 + $0x68] sm:$0xff]  ;;  %v31_v19 = vld [vmem:[%s677_s1 + $0x70] sm:$0xff]  ;;  %v32_v20 = vld [vmem:[%s677_s1 + $0x78] sm:$0xff] }
   0x8   :  { %436 = vmatprep.subr.mxu0 %v34_v4 }
   0x9   :  { %437 = vmatpush3.msra.mxu0 %v34_v4 }
   0xa   :  { %438 = vmatprep.subr.mxu0 %v33_v5 }
   0xb   :  { %439 = vmatpush3.msra.mxu0 %v33_v5 }
   0xc   :  { %441 = vmatmul.mubr.msk.f32.vlgmr.msra.gmra.mxu0 %vm38_vm1, %v18_v6 }
   0xd   :  { %443 = vmatprep.mubr.msk.f32.mxu0 %vm38_vm1, %v19_v7 }
  0x10   :  { %444 = vmatmul.mubr.msk.f32.gmra.mxu0 %vm38_vm1, %v20_v8 }
  0x11   :  { %446 = vmatprep.mubr.msk.f32.mxu0 %vm38_vm1, %v21_v9 }
  0x14   :  { %447 = vmatmul.mubr.msk.f32.gmra.mxu0 %vm38_vm1, %v22_v10 }
  0x15   :  { %449 = vmatprep.mubr.msk.f32.mxu0 %vm38_vm1, %v23_v11 }
  0x18   :  { %450 = vmatmul.mubr.msk.f32.gmra.mxu0 %vm38_vm1, %v24_v12 }
  0x19   :  { %452 = vmatprep.mubr.msk.f32.mxu0 %vm38_vm1, %v25_v13 }
  0x1c   :  { %453 = vmatmul.mubr.msk.f32.gmra.mxu0 %vm38_vm1, %v26_v14 }
  0x1d   :  { %455 = vmatprep.mubr.msk.f32.mxu0 %vm38_vm1, %v27_v15 }
  0x20   :  { %456 = vmatmul.mubr.msk.f32.gmra.mxu0 %vm38_vm1, %v28_v16 }
  0x21   :  { %458 = vmatprep.mubr.msk.f32.mxu0 %vm38_vm1, %v29_v17 }
  0x24   :  { %459 = vmatmul.mubr.msk.f32.gmra.mxu0 %vm38_vm1, %v30_v18 }
  0x25   :  { %461 = vmatprep.mubr.msk.f32.mxu0 %vm38_vm1, %v31_v19 }
  0x28   :  { %462 = vmatmul.mubr.msk.f32.gmra.mxu0 %vm38_vm1, %v32_v20 }
  0xcc   :  { %v442_v22 = vpop.f32.mrf.mxu0 }
  0xcd   :  { %v614_v24 = vmax.f32 %v442_v22, 0.0 }
  0xce   :  { %v157_v23 = vpop.f32.mrf.mxu0 }
  0xcf   :  { %v616_v25 = vmax.f32 %v157_v23, 0.0  ;;  %v326_v29 = vmul.f32 %v614_v24, %v614_v24 }
  0xd0   :  { %v445_v26 = vpop.f32.mrf.mxu0 }
  0xd1   :  { %v325_v27 = vmul.f32 %v616_v25, %v616_v25  ;;  %v622_v30 = vmax.f32 %v445_v26, 0.0 }
  0xd2   :  { %v167_v28 = vpop.f32.mrf.mxu0 }
  0xd3   :  { %v624_v31 = vmax.f32 %v167_v28, 0.0  ;;  %v341_v33 = vadd.f32 %v326_v29, %v325_v27  ;;  %v328_v36 = vmul.f32 %v622_v30, %v622_v30 }
  0xd4   :  { %v448_v32 = vpop.f32.mrf.mxu0 }
  0xd5   :  { %v327_v34 = vmul.f32 %v624_v31, %v624_v31  ;;  %v630_v38 = vmax.f32 %v448_v32, 0.0  ;;  %v252_v32 = vld [vmem:[%s679_s2] sm:$0xff] }
  0xd6   :  { %v177_v35 = vpop.f32.mrf.mxu0 }
  0xd7   :  { %v342_v37 = vadd.f32 %v341_v33, %v327_v34  ;;  %v632_v39 = vmax.f32 %v177_v35, 0.0  ;;  %v330_v44 = vmul.f32 %v630_v38, %v630_v38 }
  0xd8   :  { %v451_v40 = vpop.f32.mrf.mxu0 }
  0xd9   :  { %v329_v41 = vmul.f32 %v632_v39, %v632_v39  ;;  %v343_v42 = vadd.f32 %v342_v37, %v328_v36  ;;  %v243_v46 = vmax.f32 %v451_v40, 0.0 }
  0xda   :  { %v187_v43 = vpop.f32.mrf.mxu0 }
  0xdb   :  { %v344_v45 = vadd.f32 %v343_v42, %v329_v41  ;;  %v638_v47 = vmax.f32 %v187_v43, 0.0  ;;  %v332_v52 = vmul.f32 %v243_v46, %v243_v46 }
  0xdc   :  { %v454_v48 = vpop.f32.mrf.mxu0 }
  0xdd   :  { %v331_v49 = vmul.f32 %v638_v47, %v638_v47  ;;  %v345_v50 = vadd.f32 %v344_v45, %v330_v44  ;;  %v245_v54 = vmax.f32 %v454_v48, 0.0 }
  0xde   :  { %v197_v51 = vpop.f32.mrf.mxu0 }
  0xdf   :  { %v346_v53 = vadd.f32 %v345_v50, %v331_v49  ;;  %v244_v55 = vmax.f32 %v197_v51, 0.0  ;;  %v334_v60 = vmul.f32 %v245_v54, %v245_v54 }
  0xe0   :  { %v457_v56 = vpop.f32.mrf.mxu0 }
  0xe1   :  { %v333_v57 = vmul.f32 %v244_v55, %v244_v55  ;;  %v347_v58 = vadd.f32 %v346_v53, %v332_v52  ;;  %v247_v62 = vmax.f32 %v457_v56, 0.0 }
  0xe2   :  { %v207_v59 = vpop.f32.mrf.mxu0 }
  0xe3   :  { %v348_v61 = vadd.f32 %v347_v58, %v333_v57  ;;  %v246_v63 = vmax.f32 %v207_v59, 0.0  ;;  %v336_v4 = vmul.f32 %v247_v62, %v247_v62 }
  0xe4   :  { %v460_v0 = vpop.f32.mrf.mxu0 }
  0xe5   :  { %v335_v1 = vmul.f32 %v246_v63, %v246_v63  ;;  %v349_v2 = vadd.f32 %v348_v61, %v334_v60  ;;  %v249_v6 = vmax.f32 %v460_v0, 0.0 }
  0xe6   :  { %v217_v3 = vpop.f32.mrf.mxu0 }
  0xe7   :  { %v350_v5 = vadd.f32 %v349_v2, %v335_v1  ;;  %v248_v7 = vmax.f32 %v217_v3, 0.0  ;;  %v338_v13 = vmul.f32 %v249_v6, %v249_v6 }
  0xe8   :  { %v463_v8 = vpop.f32.mrf.mxu0 }
  0xe9   :  { %v337_v9 = vmul.f32 %v248_v7, %v248_v7  ;;  %v351_v10 = vadd.f32 %v350_v5, %v336_v4  ;;  %v251_v11 = vmax.f32 %v463_v8, 0.0 }
  0xea   :  { %v227_v12 = vpop.f32.mrf.mxu0 }
  0xeb   :  { %v352_v14 = vadd.f32 %v351_v10, %v337_v9  ;;  %v250_v15 = vmax.f32 %v227_v12, 0.0  ;;  %465 = vmatpush3.msra.mxu1 %v251_v11  ;;  %v340_v18 = vmul.f32 %v251_v11, %v251_v11 }
  0xec   :  { %466 = vmatprep.subr.mxu1 %v501_v21 }
  0xed   :  { %v339_v16 = vmul.f32 %v250_v15, %v250_v15  ;;  %v353_v17 = vadd.f32 %v352_v14, %v338_v13  ;;  %467 = vmatpush3.msra.mxu1 %v250_v15 }
  0xee   :  { %468 = vmatprep.subr.mxu1 %v501_v21 }
  0xef   :  { %v354_v19 = vadd.f32 %v353_v17, %v339_v16  ;;  %469 = vmatpush3.msra.mxu1 %v249_v6 }
  0xf0   :  { %470 = vmatprep.subr.mxu1 %v501_v21 }
  0xf1   :  { %v355_v20 = vadd.f32 %v354_v19, %v340_v18  ;;  %471 = vmatpush3.msra.mxu1 %v248_v7 }
  0xf2   :  { %472 = vmatprep.subr.mxu1 %v501_v21 }
  0xf3   :  { %v356_v22 = vrot.slane %v355_v20, 4  ;;  %473 = vmatpush3.msra.mxu1 %v247_v62 }
  0xf4   :  { %474 = vmatprep.subr.mxu1 %v501_v21 }
  0xf5   :  { %v357_v23 = vadd.f32 %v356_v22, %v355_v20  ;;  %475 = vmatpush3.msra.mxu1 %v246_v63 }
  0xf6   :  { %476 = vmatprep.subr.mxu1 %v501_v21 }
  0xf7   :  { %v358_v26 = vrot.slane %v357_v23, 2  ;;  %477 = vmatpush3.msra.mxu1 %v245_v54 }
  0xf8   :  { %478 = vmatprep.subr.mxu1 %v501_v21 }
  0xf9   :  { %v359_v27 = vadd.f32 %v358_v26, %v357_v23  ;;  %479 = vmatpush3.msra.mxu1 %v244_v55 }
  0xfa   :  { %480 = vmatprep.subr.mxu1 %v501_v21 }
  0xfb   :  { %v360_v28 = vrot.slane %v359_v27, 1  ;;  %481 = vmatpush3.msra.mxu1 %v243_v46 }
  0xfc   :  { %482 = vmatprep.subr.mxu1 %v501_v21 }
  0xfd   :  { %v361_v29 = vadd.f32 %v360_v28, %v359_v27  ;;  %483 = vmatpush3.msra.mxu1 %v638_v47 }
  0xfe   :  { %484 = vmatprep.subr.mxu1 %v501_v21 }
  0xff   :  { %362 = vst [vmem:[%s678_s4] sm:$0x1] %v361_v29  ;;  %485 = vmatpush3.msra.mxu1 %v630_v38 }
 0x100   :  { %486 = vmatprep.subr.mxu1 %v501_v21 }
 0x101   :  { %487 = vmatpush3.msra.mxu1 %v632_v39 }
 0x102   :  { %488 = vmatprep.subr.mxu1 %v501_v21 }
 0x103   :  { %489 = vmatpush3.msra.mxu1 %v622_v30 }
 0x104   :  { %490 = vmatprep.subr.mxu1 %v501_v21 }
 0x105   :  { %491 = vmatpush3.msra.mxu1 %v624_v31 }
 0x106   :  { %492 = vmatprep.subr.mxu1 %v501_v21 }
 0x107   :  { %493 = vmatpush3.msra.mxu1 %v614_v24 }
 0x108   :  { %494 = vmatprep.subr.mxu1 %v501_v21 }
 0x109   :  { %495 = vmatpush3.msra.mxu1 %v616_v25 }
 0x10a   :  { %497 = vmatmul.mubr.f32.vlgmr.msra.gmra.mxu1 %v252_v32 }
 0x1ca   :  { %v319_v33 = vpop.f32.mrf.mxu1 }
 0x1cb   :  { %323 = vst [vmem:[%s680_s3] sm:$0x1] %v319_v33  ;;  %324 = vst [vmem:[%s681_s5 - $0x1] sm:$0x2] %v319_v33 }
 0x1cc   :  { %v498_v30 = vpop.f32.mrf.mxu1 }

</bundles_post_ra>
